<compile_context>
chip_gen: v7x
topology: tpu7x:2x2x1
jax: 0.10.0
libtpu: 0.0.40
codegen_flags: <defaults>
</compile_context>

<pallas_src>
import math
import jax
import jax.numpy as jnp
from jax.experimental import pallas as pl
from jax.experimental.pallas import tpu as pltpu

# ----------------------- synthetic generator config -----------------------
Z_DIM = 32      # latent dim
W_DIM = 32      # intermediate latent dim
C_DIM = 0       # unconditional generator (label = zeros([1, 0]) is unused)
CF    = 32      # feature channels of the const synthesis input
H = W = 16      # output resolution
RGB   = 3       # output channels
OUT_ROWS = 8    # RGB padded to a full sublane tile for unmasked stores

_LRELU_GAIN = math.sqrt(2.0)   # folded into weights at init, not used in-kernel

# ---------------------- packed parameter slab layout -----------------------
# One lane-dense (40, 128) f32 slab.
#   rows [ 0:32):  lanes [  0: 32) W1            (Z_DIM, W_DIM)
#                  lanes [ 32: 64) W2 * gain     (W_DIM, W_DIM)
#                  lanes [ 64: 96) Aff * gain    (W_DIM, CF)
#                  lanes [ 96:128) zero padding
#   rows [32:40):  lanes [  0: 32) rgbW * gain * 127.5, padded to 8 rows
#                  lanes [ 32: 64) row 0: b1, row 1: b2, row 2: aff_b
#                  lane   64       rgb_b * 127.5 + 128 column, padded to 8 rows
SLAB_ROWS  = 40
SLAB_LANES = 128
R_WBLK = 0          # weight block rows [0:32)
R_PBLK = 32         # small-params block rows [32:40)
L_W1   = 0
L_W2   = 32
L_AFF  = 64
L_BIAS = 32         # within the params block
L_RGBB = 64         # within the params block


def _lrelu(x):
    # gain already folded into the next layer's weights
    return jnp.maximum(x, 0.2 * x)


# ------------------------------ fused kernel -------------------------------
def wrapper_kernel(z_ref, slab_ref, const_ref, out_ref):
    """z -> mapping MLP -> style affine -> modulated const -> ToRGB -> image.

    z_ref     : (1, Z_DIM)        latent row (no host-side transpose)
    slab_ref  : (40, 128)         lane-dense packed weights/biases
    const_ref : (CF, H*W)         learned const features, pixels on lanes
    out_ref   : (OUT_ROWS, H*W)   lane-dense CHW-flat image, already *127.5+128
    """
    z = z_ref[...]                                   # (1, Z_DIM)

    wblk = slab_ref[R_WBLK:R_WBLK + 32, :]           # (32, 128) dense load
    pblk = slab_ref[R_PBLK:R_PBLK + 8, :]            # ( 8, 128) dense load

    w1    = wblk[:, L_W1:L_W1 + W_DIM]               # (Z_DIM, W_DIM)
    w2g   = wblk[:, L_W2:L_W2 + W_DIM]               # (W_DIM, W_DIM), gain folded
    affg  = wblk[:, L_AFF:L_AFF + CF]                # (W_DIM, CF),    gain folded
    rgbw  = pblk[:, 0:CF]                            # (OUT_ROWS, CF), gain*127.5 folded
    b1    = pblk[0:1, L_BIAS:L_BIAS + W_DIM]         # (1, W_DIM)
    b2    = pblk[1:2, L_BIAS:L_BIAS + W_DIM]         # (1, W_DIM)
    affb  = pblk[2:3, L_BIAS:L_BIAS + CF]            # (1, CF)
    rgbb  = pblk[:, L_RGBB:L_RGBB + 1]               # (OUT_ROWS, 1), *127.5+128 folded

    # Mapping MLP, row-oriented (32 output lanes per matmul).
    h = _lrelu(jnp.dot(z, w1, preferred_element_type=jnp.float32) + b1)     # (1, W_DIM)
    wl = _lrelu(jnp.dot(h, w2g, preferred_element_type=jnp.float32) + b2)   # (1, W_DIM)

    # Style affine (row) -> per-channel column for the const modulation.
    style = jnp.dot(wl, affg, preferred_element_type=jnp.float32) + affb    # (1, CF)
    # Row -> column without relying on small-shape transpose lowering:
    # broadcast over sublanes, keep the diagonal, reduce along lanes.
    sb = jnp.broadcast_to(style, (CF, CF))
    rows = jax.lax.broadcasted_iota(jnp.int32, (CF, CF), 0)
    cols = jax.lax.broadcasted_iota(jnp.int32, (CF, CF), 1)
    style_col = jnp.sum(jnp.where(rows == cols, sb, 0.0),
                        axis=1, keepdims=True)                              # (CF, 1)

    # Per-channel modulation of the const feature slab (lrelu gain folded into rgbw).
    feat = _lrelu(const_ref[...] * style_col)                               # (CF, H*W)

    # ToRGB 1x1 conv; `* 127.5 + 128` pre-folded into rgbw/rgbb, so this store
    # is the final image, lane-dense and padded to a full (8, 256) tile.
    out_ref[...] = jnp.dot(rgbw, feat, preferred_element_type=jnp.float32) + rgbb


# ------------------------------ host wrapper -------------------------------
def wrapper_forward(z, params):
    """Equivalent of wrapper.forward(z) with the synthetic generator."""
    # Original: label = torch.zeros([1, c_dim]); unconditional (c_dim=0), unused.
    cost = pl.CostEstimate(
        flops=2 * (Z_DIM * W_DIM + W_DIM * W_DIM + W_DIM * CF
                   + OUT_ROWS * CF * H * W) + 4 * CF * H * W,
        transcendentals=0,
        bytes_accessed=(Z_DIM * 4 + SLAB_ROWS * SLAB_LANES * 4
                        + CF * H * W * 4 + OUT_ROWS * H * W * 4),
    )
    chw = pl.pallas_call(
        wrapper_kernel,
        out_shape=jax.ShapeDtypeStruct((OUT_ROWS, H * W), jnp.float32),
        in_specs=[pl.BlockSpec(memory_space=pltpu.MemorySpace.VMEM)] * 3,
        out_specs=pl.BlockSpec(memory_space=pltpu.MemorySpace.VMEM),
        cost_estimate=cost,
    )(z.astype(jnp.float32), params["slab"], params["const"])
    # (RGB, H*W) -> (H, W, RGB): matches `img.permute(0, 2, 3, 1)[0]`.
    return jnp.transpose(chw[:RGB]).reshape(H, W, RGB)


def init_params(key):
    ks = jax.random.split(key, 8)
    s = 1.0 / math.sqrt(Z_DIM)
    g = _LRELU_GAIN
    map_w1 = jax.random.normal(ks[0], (Z_DIM, W_DIM), jnp.float32) * s
    map_b1 = jax.random.normal(ks[1], (1, W_DIM), jnp.float32) * 0.01
    map_w2 = jax.random.normal(ks[2], (W_DIM, W_DIM), jnp.float32) * s
    map_b2 = jax.random.normal(ks[3], (1, W_DIM), jnp.float32) * 0.01
    aff_w  = jax.random.normal(ks[4], (W_DIM, CF), jnp.float32) * s
    aff_b  = jnp.ones((1, CF), jnp.float32)          # StyleGAN affine bias init = 1
    const  = jax.random.normal(ks[5], (CF, H * W), jnp.float32)
    rgb_w  = jax.random.normal(ks[6], (CF, RGB), jnp.float32) / math.sqrt(CF)
    rgb_b  = jax.random.normal(ks[7], (1, RGB), jnp.float32) * 0.01

    # Fold lrelu gains into downstream weights and the `* 127.5 + 128` output
    # transform (from the PyTorch wrapper) into ToRGB.
    map_w2_s = map_w2 * g                            # absorbs gain of lrelu #1
    aff_w_s  = aff_w * g                             # absorbs gain of lrelu #2
    rgb_w_s  = (rgb_w * g * 127.5).T                 # (RGB, CF); absorbs feat-lrelu gain
    rgb_b_s  = rgb_b * 127.5 + 128.0                 # (1, RGB)

    slab = jnp.zeros((SLAB_ROWS, SLAB_LANES), jnp.float32)
    # weight block (lane-dense, 3 x 32 lanes used)
    slab = slab.at[R_WBLK:R_WBLK + Z_DIM, L_W1:L_W1 + W_DIM].set(map_w1)
    slab = slab.at[R_WBLK:R_WBLK + W_DIM, L_W2:L_W2 + W_DIM].set(map_w2_s)
    slab = slab.at[R_WBLK:R_WBLK + W_DIM, L_AFF:L_AFF + CF].set(aff_w_s)
    # small-params block
    slab = slab.at[R_PBLK:R_PBLK + RGB, 0:CF].set(rgb_w_s)          # rows 3..7 zero
    slab = slab.at[R_PBLK + 0, L_BIAS:L_BIAS + W_DIM].set(map_b1[0])
    slab = slab.at[R_PBLK + 1, L_BIAS:L_BIAS + W_DIM].set(map_b2[0])
    slab = slab.at[R_PBLK + 2, L_BIAS:L_BIAS + CF].set(aff_b[0])
    slab = slab.at[R_PBLK:R_PBLK + RGB, L_RGBB].set(rgb_b_s[0])     # rows 3..7 zero
    return {"slab": slab, "const": const}


if __name__ == "__main__":
    key = jax.random.PRNGKey(0)
    pkey, zkey = jax.random.split(key)
    params = init_params(pkey)
    z = jax.random.normal(zkey, (1, Z_DIM), jnp.float32)      # latent input

    img = jax.jit(wrapper_forward)(z, params)
    img = jax.block_until_ready(img)

    assert img.shape == (H, W, RGB), img.shape
    assert img.dtype == jnp.float32
    print("KERNEL_OK")
</pallas_src>

<mosaic_0001>
module attributes {stable_mosaic.version = 11 : i64} {
  func.func @wrapper_kernel(%arg0: memref<1x32xf32, #tpu.memory_space<vmem>>, %arg1: memref<40x128xf32, #tpu.memory_space<vmem>>, %arg2: memref<32x256xf32, #tpu.memory_space<vmem>>, %arg3: memref<8x256xf32, #tpu.memory_space<vmem>>) attributes {dimension_semantics = [], scalar_prefetch = 0 : i64, scratch_operands = 0 : i64, tpu.core_type = #tpu.core_type<tc>} {
    %c0 = arith.constant 0 : index
    %c0_0 = arith.constant 0 : index
    %0 = vector.load %arg0[%c0, %c0_0] : memref<1x32xf32, #tpu.memory_space<vmem>>, vector<1x32xf32>
    %c0_1 = arith.constant 0 : index
    %c0_2 = arith.constant 0 : index
    %1 = vector.load %arg1[%c0_1, %c0_2] : memref<40x128xf32, #tpu.memory_space<vmem>>, vector<32x128xf32>
    %c32 = arith.constant 32 : index
    %c0_3 = arith.constant 0 : index
    %2 = vector.load %arg1[%c32, %c0_3] : memref<40x128xf32, #tpu.memory_space<vmem>>, vector<8x128xf32>
    %3 = vector.extract_strided_slice %1 {offsets = [0, 0], sizes = [32, 32], strides = [1, 1]} : vector<32x128xf32> to vector<32x32xf32>
    %4 = vector.extract_strided_slice %1 {offsets = [0, 32], sizes = [32, 32], strides = [1, 1]} : vector<32x128xf32> to vector<32x32xf32>
    %5 = vector.extract_strided_slice %1 {offsets = [0, 64], sizes = [32, 32], strides = [1, 1]} : vector<32x128xf32> to vector<32x32xf32>
    %6 = vector.extract_strided_slice %2 {offsets = [0, 0], sizes = [8, 32], strides = [1, 1]} : vector<8x128xf32> to vector<8x32xf32>
    %7 = vector.extract_strided_slice %2 {offsets = [0, 32], sizes = [1, 32], strides = [1, 1]} : vector<8x128xf32> to vector<1x32xf32>
    %8 = vector.extract_strided_slice %2 {offsets = [1, 32], sizes = [1, 32], strides = [1, 1]} : vector<8x128xf32> to vector<1x32xf32>
    %9 = vector.extract_strided_slice %2 {offsets = [2, 32], sizes = [1, 32], strides = [1, 1]} : vector<8x128xf32> to vector<1x32xf32>
    %10 = vector.extract_strided_slice %2 {offsets = [0, 64], sizes = [8, 1], strides = [1, 1]} : vector<8x128xf32> to vector<8x1xf32>
    %cst = arith.constant dense<0.000000e+00> : vector<1x32xf32>
    %11 = tpu.matmul %0, %3, %cst {dimension_numbers = #tpu.dot_dimension_numbers<[1], [0], [0], [1], [0, 0, 1, 1], [], []>} : vector<1x32xf32>, vector<32x32xf32>, vector<1x32xf32> -> vector<1x32xf32>
    %12 = arith.addf %11, %7 : vector<1x32xf32>
    %cst_4 = arith.constant 2.000000e-01 : f32
    %13 = vector.broadcast %cst_4 : f32 to vector<1x32xf32>
    %14 = arith.mulf %13, %12 : vector<1x32xf32>
    %15 = arith.maximumf %12, %14 : vector<1x32xf32>
    %cst_5 = arith.constant dense<0.000000e+00> : vector<1x32xf32>
    %16 = tpu.matmul %15, %4, %cst_5 {dimension_numbers = #tpu.dot_dimension_numbers<[1], [0], [0], [1], [0, 0, 1, 1], [], []>} : vector<1x32xf32>, vector<32x32xf32>, vector<1x32xf32> -> vector<1x32xf32>
    %17 = arith.addf %16, %8 : vector<1x32xf32>
    %cst_6 = arith.constant 2.000000e-01 : f32
    %18 = vector.broadcast %cst_6 : f32 to vector<1x32xf32>
    %19 = arith.mulf %18, %17 : vector<1x32xf32>
    %20 = arith.maximumf %17, %19 : vector<1x32xf32>
    %cst_7 = arith.constant dense<0.000000e+00> : vector<1x32xf32>
    %21 = tpu.matmul %20, %5, %cst_7 {dimension_numbers = #tpu.dot_dimension_numbers<[1], [0], [0], [1], [0, 0, 1, 1], [], []>} : vector<1x32xf32>, vector<32x32xf32>, vector<1x32xf32> -> vector<1x32xf32>
    %22 = arith.addf %21, %9 : vector<1x32xf32>
    %23 = vector.shape_cast %22 : vector<1x32xf32> to vector<1x32xf32>
    %24 = vector.broadcast %23 : vector<1x32xf32> to vector<32x32xf32>
    %25 = tpu.iota {dimensions = array<i32: 0>} : vector<32x32xi32>
    %26 = tpu.iota {dimensions = array<i32: 1>} : vector<32x32xi32>
    %27 = arith.cmpi eq, %25, %26 : vector<32x32xi32>
    %cst_8 = arith.constant 0.000000e+00 : f32
    %28 = vector.broadcast %cst_8 : f32 to vector<32x32xf32>
    %29 = arith.select %27, %24, %28 : vector<32x32xi1>, vector<32x32xf32>
    %cst_9 = arith.constant dense<0.000000e+00> : vector<32xf32>
    %30 = vector.multi_reduction <add>, %29, %cst_9 [1] : vector<32x32xf32> to vector<32xf32>
    %31 = vector.shape_cast %30 : vector<32xf32> to vector<32x1xf32>
    %c0_10 = arith.constant 0 : index
    %c0_11 = arith.constant 0 : index
    %32 = vector.load %arg2[%c0_10, %c0_11] : memref<32x256xf32, #tpu.memory_space<vmem>>, vector<32x256xf32>
    %33 = vector.broadcast %31 : vector<32x1xf32> to vector<32x256xf32>
    %34 = arith.mulf %32, %33 : vector<32x256xf32>
    %cst_12 = arith.constant 2.000000e-01 : f32
    %35 = vector.broadcast %cst_12 : f32 to vector<32x256xf32>
    %36 = arith.mulf %35, %34 : vector<32x256xf32>
    %37 = arith.maximumf %34, %36 : vector<32x256xf32>
    %cst_13 = arith.constant dense<0.000000e+00> : vector<8x256xf32>
    %38 = tpu.matmul %6, %37, %cst_13 {dimension_numbers = #tpu.dot_dimension_numbers<[1], [0], [0], [1], [0, 0, 1, 1], [], []>} : vector<8x32xf32>, vector<32x256xf32>, vector<8x256xf32> -> vector<8x256xf32>
    %39 = vector.broadcast %10 : vector<8x1xf32> to vector<8x256xf32>
    %40 = arith.addf %38, %39 : vector<8x256xf32>
    %c0_14 = arith.constant 0 : index
    %c0_15 = arith.constant 0 : index
    %41 = vector.load %arg3[%c0_14, %c0_15] : memref<8x256xf32, #tpu.memory_space<vmem>>, vector<8x256xf32>
    tpu.vector_store %arg3[%c0_14, %c0_15], %40 {strides = array<i32>} : memref<8x256xf32, #tpu.memory_space<vmem>>, vector<8x256xf32>,
    return
  }
}

</mosaic_0001>

<bundles_post_ra>
// kernel: wrapper_forward.1
= control target key start
LH: loop header
LB: loop body
LE: loop exit
PB: predicated region body
PF: predicated region fallthrough
CT: control target
= control target key end

     0   :  { %8 = vsyncpa [#allocation3], 0  ;;  %s751_s0 = inlined_call_operand.hbm [shape: f32[1,32], index: 0, kind: input, shape index: {}]   ;;  %s752_s1 = inlined_call_operand.hbm [shape: f32[40,128], index: 1, kind: input, shape index: {}]   ;;  %s753_s2 = inlined_call_operand.hbm [shape: f32[32,256], index: 2, kind: input, shape index: {}]   ;;  %s754_s3 = inlined_call_operand.vmem [shape: f32[8,256], index: 3, kind: output, shape index: {}]  }
   0x1   :  { %9 = vsyncpa [#allocation5], 0  ;;  %s653_s12 = smov [#allocation4]   ;;  %s583_s16 = scalar_lea.hbm %s752_s1, 640 }
   0x2   :  { %s25_s13 = sshll.u32 %s653_s12, 4  ;;  %p584_p0 = scmp.ne.s32.totalorder %s752_s1, %s583_s16  ;;  %s26_s13 = int_to_ptr.vmem [resolvable:$true] %s25_s13 }
   0x3   :  { %p587_p1 = scmp.lt.u32.totalorder %s583_s16, %s752_s1 }
   0x5   :  { %p589_p2 = pnand %p587_p1, %p584_p0 }
   0x7   :  { %592 = shalt.err (!%p589_p2)
}
   0x8   :  { %s593_s21 = scalar_lea.vmem %s26_s13, 640  ;;  %p598_p4 = scmp.lt.s32.totalorder %s26_s13, %s26_s13 }
   0x9   :  { %p594_p3 = scmp.ne.s32.totalorder %s26_s13, %s593_s21  ;;  %p599_p5 = scmp.lt.s32.totalorder %s593_s21, %s593_s21 }
   0xb   :  { %p600_p6 = por %p599_p5, %p598_p4 }
   0xd   :  { %p601_p7 = pnand %p600_p6, %p594_p3 }
   0xf   :  { %604 = shalt.err (!%p601_p7)
}
  0x10   :  { %s654_s22 = smov 128   ;;  %s655_s23 = smov 8  }
  0x11   :  { %31 = dma.hbm_to_vmem [thread:$0]  %s752_s1, 640, %s26_s13, [#allocation5], %s654_s22, %s654_s22, %s655_s23  }
  0x12   :  { %s656_s26 = smov [#allocation2]   ;;  %s657_s28 = smov [#allocation6]  }
  0x13   :  { %s16_s27 = sshll.u32 %s656_s26, 4  ;;  %s37_s29 = sshll.u32 %s657_s28, 4  ;;  %s17_s27 = int_to_ptr.vmem [resolvable:$true] %s16_s27  ;;  %s38_s29 = int_to_ptr.vmem [resolvable:$true] %s37_s29 }
  0x14   :  { %s605_s5 = scalar_lea.hbm %s751_s0, 16 }
  0x15   :  { %p606_p8 = scmp.ne.s32.totalorder %s751_s0, %s605_s5  ;;  %p609_p9 = scmp.lt.u32.totalorder %s605_s5, %s751_s0 }
  0x17   :  { %p611_p10 = pnand %p609_p9, %p606_p8 }
  0x19   :  { %614 = shalt.err (!%p611_p10)
}
  0x1a   :  { %s615_s1 = scalar_lea.vmem %s17_s27, 16  ;;  %s619_s10 = scalar_lea.vmem %s17_s27, 32 }
  0x1b   :  { %p616_p11 = scmp.ne.s32.totalorder %s17_s27, %s615_s1  ;;  %p620_p12 = scmp.lt.s32.totalorder %s17_s27, %s17_s27 }
  0x1c   :  { %p621_p13 = scmp.lt.s32.totalorder %s619_s10, %s615_s1 }
  0x1e   :  { %p622_p0 = por %p621_p13, %p620_p12 }
  0x20   :  { %p623_p1 = pnand %p622_p0, %p616_p11 }
  0x22   :  { %626 = shalt.err (!%p623_p1)
}
  0x23   :  { %19 = dma.hbm_to_vmem [thread:$0]  %s751_s0, 16, %s17_s27, [#allocation3]  }
  0x24   :  { %s627_s15 = scalar_lea.hbm %s753_s2, 1024 }
  0x25   :  { %p628_p2 = scmp.ne.s32.totalorder %s753_s2, %s627_s15  ;;  %p631_p3 = scmp.lt.u32.totalorder %s627_s15, %s753_s2 }
  0x27   :  { %p633_p4 = pnand %p631_p3, %p628_p2 }
  0x29   :  { %636 = shalt.err (!%p633_p4)
}
  0x2a   :  { %s637_s20 = scalar_lea.vmem %s38_s29, 1024  ;;  %p642_p6 = scmp.lt.s32.totalorder %s38_s29, %s38_s29 }
  0x2b   :  { %p638_p5 = scmp.ne.s32.totalorder %s38_s29, %s637_s20  ;;  %p643_p7 = scmp.lt.s32.totalorder %s637_s20, %s637_s20 }
  0x2d   :  { %p644_p8 = por %p643_p7, %p642_p6 }
  0x2f   :  { %p645_p9 = pnand %p644_p8, %p638_p5 }
  0x31   :  { %648 = shalt.err (!%p645_p9)
}
  0x32   :  { %s658_s0 = smov 256   ;;  %s659_s21 = smov 16  }
  0x33   :  { %43 = dma.hbm_to_vmem [thread:$0]  %s753_s2, 1024, %s38_s29, [#allocation5], %s658_s0, %s658_s0, %s659_s21  }
  0x34   :  { %649 = dma.done.wait [#allocation3], 16  }
  0x35   :  { %650 = vsyncadd [#allocation3], 4294967280 }
  0x36   :  { %651 = dma.done.wait [#allocation5], 1664  }
  0x37   :  { %652 = vsyncadd [#allocation5], 4294965632  ;;  %v660_v0 = vmov 0.0|0.0   ;;  %vm661_vm0 = vmmov 0   ;;  %v662_v1 = vmov 0.0   ;;  %v54_v2 = vld [vmem:[#allocation4] sm:$0xff]  ;;  %v323_v42 = vlaneseq }
  0x38   :  { %523 = vmatprep.subr.bf16.mxu0 %v660_v0  ;;  %498 = vmatprep.mubr.msk.f32.mxu0 %vm661_vm0, %v662_v1  ;;  %v55_v3 = vld [vmem:[#allocation4 + $0x8] sm:$0xff]  ;;  %v56_v4 = vld [vmem:[#allocation4 + $0x10] sm:$0xff]  ;;  %v57_v6 = vld [vmem:[#allocation4 + $0x18] sm:$0xff]  ;;  %s663_s2 = smov 96   ;;  %vm63_vm1 = vcmask 261120   ;;  %s664_s24 = smov 64  }
  0x39   :  { %529 = vmatprep.subr.bf16.mxu1 %v660_v0  ;;  %509 = vmatprep.mubr.msk.f32.mxu1 %vm661_vm0, %v662_v1  ;;  %v524_v5 = vpack.c.bf16 %v55_v3, %v54_v2  ;;  %v562_v7 = vpack.i.bf16 %v55_v3, %v54_v2  ;;  %v567_v8 = vpack.i.bf16 %v57_v6, %v56_v4  ;;  %v726_v10 = vld [vmem:[#allocation4 + $0x20] sm:$0xff]  ;;  %v53_v11 = vld [vmem:[#allocation2] sm:$0x1]  ;;  %v324_v43 = vshrl.u32 %v323_v42, 7  ;;  %v355_v2 = vld [vmem:[#allocation6 + $0x8] sm:$0xff] }
  0x3a   :  { %v527_v9 = vpack.c.bf16 %v57_v6, %v56_v4  ;;  %v155_v12 = vrot.slane %v726_v10, 1  ;;  %v246_v35 = vrot.slane %v726_v10, 2  ;;  %v333_v46 = vand.u32 127, %v323_v42  ;;  %v356_v63 = vld [vmem:[#allocation6 + $0x10] sm:$0xff] }
  0x3b   :  { %525 = vmatpush3.bf16.msra.mxu0 %v524_v5  ;;  %563 = vrot.lane.b32.xlu0 %v562_v7, %s663_s2  ;;  %v329_v45 = vadd.s32 8, %v324_v43  ;;  %v325_v47 = vsub.s32 0, %v324_v43  ;;  %v330_v49 = vadd.s32 16, %v324_v43  ;;  %v331_v50 = vadd.s32 24, %v324_v43 }
  0x3c   :  { %526 = vmatprep.subr.bf16.mxu0 %v660_v0  ;;  %568 = vrot.lane.b32.xlu1 %v567_v8, %s663_s2  ;;  %vm334_vm3 = vcmp.eq.s32.totalorder %v324_v43, %v333_v46  ;;  %v665_v62 = vmov 64  }
  0x3d   :  { %vm335_vm2 = vcmp.eq.s32.totalorder %v329_v45, %v333_v46  ;;  %vm336_vm4 = vcmp.eq.s32.totalorder %v330_v49, %v333_v46  ;;  %vm337_vm5 = vcmp.eq.s32.totalorder %v331_v50, %v333_v46  ;;  %582 = vset.pattern.permute.xlu0 %v665_v62 }
  0x3f   :  { %528 = vmatpush3.bf16.msra.mxu0 %v527_v9  ;;  %60 = vrot.lane.b32.xlu0 %v726_v10, %s663_s2  ;;  %v358_v9 = vld [vmem:[#allocation6 + $0x20] sm:$0xff] }
  0x40   :  { %535 = vmatprep.subr.bf16.mxu0 %v660_v0  ;;  %573 = vrot.lane.b32.xlu1 %v562_v7, %s664_s24 }
  0x42   :  { %499 = vmatmul.mubr.msk.f32.vlgmr.msra.gmra.mrb[0].mxu0 %vm63_vm1, %v53_v11  ;;  %v359_v11 = vld [vmem:[#allocation6 + $0x28] sm:$0xff] }
  0x43   :  { %520 = vmatprep.mubr.msk.f32.mxu0 %vm661_vm0, %v662_v1  ;;  %156 = vrot.lane.b32.xlu0 %v155_v12, %s663_s2  ;;  %v360_v12 = vld [vmem:[#allocation6 + $0x30] sm:$0xff] }
  0x44   :  { %578 = vrot.lane.b32.xlu1 %v567_v8, %s664_s24 }
  0x47   :  { %247 = vrot.lane.b32.xlu0 %v246_v35, %s663_s2 }
  0xad   :  { %v564_v13 = vpop.permute.xlu0 %563 }
  0xae   :  { %v566_v14 = vunpack.i.h.bf16 %v564_v13  ;;  %v565_v15 = vunpack.i.l.bf16 %v564_v13  ;;  %v569_v16 = vpop.permute.xlu1 %568  ;;  %v361_v13 = vld [vmem:[#allocation6 + $0x38] sm:$0xff] }
  0xaf   :  { %v571_v17 = vunpack.i.h.bf16 %v569_v16  ;;  %v570_v18 = vunpack.i.l.bf16 %v569_v16 }
  0xb0   :  { %v530_v19 = vpack.c.bf16 %v566_v14, %v565_v15 }
  0xb1   :  { %v533_v20 = vpack.c.bf16 %v571_v17, %v570_v18  ;;  %v61_v24 = vpop.permute.xlu0 %60 }
  0xb2   :  { %531 = vmatpush3.bf16.msra.mxu1 %v530_v19  ;;  %v574_v21 = vpop.permute.xlu1 %573 }
  0xb3   :  { %532 = vmatprep.subr.bf16.mxu1 %v660_v0  ;;  %v576_v22 = vunpack.i.h.bf16 %v574_v21  ;;  %v575_v23 = vunpack.i.l.bf16 %v574_v21 }
  0xb5   :  { %v536_v25 = vpack.c.bf16 %v576_v22, %v575_v23  ;;  %v157_v36 = vpop.permute.xlu0 %156 }
  0xb6   :  { %534 = vmatpush3.bf16.msra.mxu1 %v533_v20  ;;  %v579_v26 = vpop.permute.xlu1 %578 }
  0xb7   :  { %v581_v28 = vunpack.i.h.bf16 %v579_v26  ;;  %v580_v29 = vunpack.i.l.bf16 %v579_v26  ;;  %537 = vmatpush3.bf16.msra.mxu0 %v536_v25 }
  0xb8   :  { %538 = vmatprep.subr.bf16.mxu0 %v660_v0  ;;  %v357_v0 = vld [vmem:[#allocation6 + $0x18] sm:$0xff] }
  0xb9   :  { %v539_v32 = vpack.c.bf16 %v581_v28, %v580_v29  ;;  %v248_v44 = vpop.permute.xlu0 %247 }
  0xbb   :  { %540 = vmatpush3.bf16.msra.mxu0 %v539_v32 }
 0x115   :  { %v133_v27 = vpop.f32.mrb[0].mxu0 }
 0x116   :  { %v134_v30 = vadd.f32 %v133_v27, %v61_v24  ;;  %v500_v31 = vpop.f32.mrb[1].mxu0 }
 0x118   :  { %v137_v33 = vmul.f32 0.2, %v134_v30 }
 0x11a   :  { %v138_v34 = vmax.f32 %v134_v30, %v137_v33 }
 0x11c   :  { %510 = vmatmul.mubr.msk.f32.vlgmr.msra.gmra.mrb[0].mxu1 %vm63_vm1, %v138_v34 }
 0x11d   :  { %456 = vmatprep.mubr.f32.mxu1 %v662_v1  ;;  %v354_v1 = vld [vmem:[#allocation6] sm:$0xff] }
 0x1ef   :  { %v228_v37 = vpop.f32.mrb[0].mxu1 }
 0x1f0   :  { %v229_v38 = vadd.f32 %v228_v37, %v157_v36  ;;  %v511_v39 = vpop.f32.mrb[1].mxu1 }
 0x1f2   :  { %v232_v40 = vmul.f32 0.2, %v229_v38 }
 0x1f4   :  { %v233_v41 = vmax.f32 %v229_v38, %v232_v40 }
 0x1f6   :  { %521 = vmatmul.mubr.msk.f32.vlgmr.msra.gmra.mrb[2].mxu0 %vm63_vm1, %v233_v41 }
 0x2c9   :  { %v319_v48 = vpop.f32.mrb[2].mxu0 }
 0x2ca   :  { %v320_v51 = vadd.f32 %v319_v48, %v248_v44  ;;  %v522_v52 = vpop.f32.mrb[3].mxu0 }
 0x2cc   :  { %v326_v53 = vrot.slane %v320_v51, %v325_v47 }
 0x2ce   :  { %v339_v54 = vsel %vm335_vm2, %v326_v53, 0.0  ;;  %v338_v55 = vsel %vm334_vm3, %v326_v53, 0.0  ;;  %v340_v58 = vsel %vm336_vm4, %v326_v53, 0.0  ;;  %v341_v59 = vsel %vm337_vm5, %v326_v53, 0.0 }
 0x2cf   :  { %v345_v56 = vsel %vm63_vm1, %v339_v54, 0.0  ;;  %v342_v57 = vsel %vm63_vm1, %v338_v55, 0.0  ;;  %v348_v60 = vsel %vm63_vm1, %v340_v58, 0.0  ;;  %v351_v61 = vsel %vm63_vm1, %v341_v59, 0.0 }
 0x2d0   :  { %346 = vadd.xlane.f32.xlu0 %v345_v56  ;;  %343 = vadd.xlane.f32.xlu1 %v342_v57 }
 0x2d4   :  { %349 = vadd.xlane.f32.xlu0 %v348_v60  ;;  %352 = vadd.xlane.f32.xlu1 %v351_v61 }
 0x2ea   :  { %387 = vperm.xlu0 %582, %v726_v10  }
 0x35d   :  { %v347_v3 = vpop.xlane.xlu0 %346  ;;  %v344_v4 = vpop.xlane.xlu1 %343 }
 0x35e   :  { %v364_v5 = vmul.f32 %v356_v63, %v347_v3  ;;  %v365_v6 = vmul.f32 %v357_v0, %v347_v3  ;;  %v362_v7 = vmul.f32 %v354_v1, %v344_v4  ;;  %v363_v8 = vmul.f32 %v355_v2, %v344_v4 }
 0x360   :  { %v372_v14 = vmul.f32 0.2, %v364_v5  ;;  %v373_v15 = vmul.f32 0.2, %v365_v6  ;;  %v370_v16 = vmul.f32 0.2, %v362_v7 }
 0x361   :  { %v371_v17 = vmul.f32 0.2, %v363_v8  ;;  %v350_v18 = vpop.xlane.xlu0 %349  ;;  %v353_v19 = vpop.xlane.xlu1 %352 }
 0x362   :  { %v380_v20 = vmax.f32 %v364_v5, %v372_v14  ;;  %v381_v21 = vmax.f32 %v365_v6, %v373_v15  ;;  %v378_v22 = vmax.f32 %v362_v7, %v370_v16  ;;  %v366_v23 = vmul.f32 %v358_v9, %v350_v18 }
 0x363   :  { %v379_v24 = vmax.f32 %v363_v8, %v371_v17  ;;  %v367_v25 = vmul.f32 %v359_v11, %v350_v18  ;;  %v368_v26 = vmul.f32 %v360_v12, %v353_v19  ;;  %v369_v27 = vmul.f32 %v361_v13, %v353_v19 }
 0x364   :  { %v543_v28 = vpack.c.bf16 %v380_v20, %v378_v22  ;;  %v374_v29 = vmul.f32 0.2, %v366_v23 }
 0x365   :  { %v375_v30 = vmul.f32 0.2, %v367_v25  ;;  %v376_v31 = vmul.f32 0.2, %v368_v26  ;;  %v377_v32 = vmul.f32 0.2, %v369_v27  ;;  %v541_v33 = vpack.c.bf16 %v381_v21, %v379_v24 }
 0x366   :  { %v382_v34 = vmax.f32 %v366_v23, %v374_v29 }
 0x367   :  { %v383_v35 = vmax.f32 %v367_v25, %v375_v30  ;;  %v384_v36 = vmax.f32 %v368_v26, %v376_v31  ;;  %v385_v37 = vmax.f32 %v369_v27, %v377_v32  ;;  %542 = vmatprep.subr.bf16.mxu1 %v541_v33 }
 0x368   :  { %544 = vmatpush1.bf16.msra.mxu1 %v543_v28 }
 0x369   :  { %v547_v38 = vpack.c.bf16 %v384_v36, %v382_v34  ;;  %v545_v39 = vpack.c.bf16 %v385_v37, %v383_v35  ;;  %v388_v40 = vpop.permute.xlu0 %387 }
 0x36b   :  { %546 = vmatprep.subr.bf16.mxu1 %v545_v39 }
 0x36c   :  { %548 = vmatpush1.bf16.msra.mxu1 %v547_v38 }
 0x36f   :  { %474 = vmatmul.mubr.msk.f32.vlgmr.msra.gmra.mrb[2].mxu1 %vm63_vm1, %v726_v10 }
 0x442   :  { %v458_v41 = vpop.f32.mrb[2].mxu1 }
 0x443   :  { %v459_v42 = vadd.f32 %v458_v41, %v388_v40  ;;  %v460_v43 = vpop.f32.mrb[3].mxu1 }
 0x444   :  { %v461_v44 = vadd.f32 %v460_v43, %v388_v40 }
 0x445   :  { %463 = vst [vmem:[%s754_s3] sm:$0xff] %v459_v42 }
 0x446   :  { %464 = vst [vmem:[%s754_s3 + $0x8] sm:$0xff] %v461_v44 }
 0x447   :  { %469 = vsyncpa [#allocation3], 1 }
 0x448   :  { %470 = vsyncpa [#allocation5], 1 }

</bundles_post_ra>
